<compile_context>
chip_gen: v5e
topology: v5e:2x2
jax: 0.10.0
libtpu: 0.0.40
codegen_flags: <defaults>
</compile_context>

<pallas_src>
import jax
import jax.numpy as jnp
from jax.experimental import pallas as pl
from jax.experimental.pallas import tpu as pltpu


def _round_up(v, m):
    return (v + m - 1) // m * m


def readout_kernel(batch_ref, x_ref, w_ref, out_ref,
                   sum_acc, cnt_acc, tg_acc):
    """grid = (phase, node_tile).

    phase 0          : accumulate segment sums + per-graph node counts.
    (phase 1, n == 0): compute transformed_global once.
    phase 1          : accumulate the attention-weighted add-pool.
    """
    phase = pl.program_id(0)
    n = pl.program_id(1)

    num_graphs = out_ref.shape[0]            # padded B (multiple of 8)
    tile_n = x_ref.shape[0]                  # node tile (multiple of 128)

    x = x_ref[...]                           # [TN, H]   matmul dtype
    b_row = batch_ref[...]                   # [1, TN]   int32
    graph_iota = jax.lax.broadcasted_iota(jnp.int32, (num_graphs, tile_n), 0)
    onehot = graph_iota == b_row             # [B, TN]   bool, lane-dense over N

    @pl.when(jnp.logical_and(phase == 0, n == 0))
    def _init():
        sum_acc[...] = jnp.zeros_like(sum_acc)
        cnt_acc[...] = jnp.zeros_like(cnt_acc)
        out_ref[...] = jnp.zeros_like(out_ref)

    @pl.when(phase == 0)
    def _accumulate_mean_pool():
        # global_add_pool(x): [B, TN] @ [TN, H] -> [B, H]   (K = TN, lane-dense)
        sum_acc[...] += jax.lax.dot_general(
            onehot.astype(x.dtype), x, (((1,), (0,)), ((), ())),
            preferred_element_type=jnp.float32)
        cnt_acc[...] += jnp.sum(onehot, axis=-1, keepdims=True,
                                dtype=jnp.float32)

    @pl.when(jnp.logical_and(phase == 1, n == 0))
    def _transform_global():
        inv_cnt = pl.reciprocal(jnp.maximum(cnt_acc[...], 1.0), approx=False)
        mean_pool = (sum_acc[...] * inv_cnt).astype(x.dtype)      # [B, H]
        tg_acc[...] = jnp.tanh(jax.lax.dot_general(
            mean_pool, w_ref[...], (((1,), (0,)), ((), ())),
            preferred_element_type=jnp.float32)).astype(tg_acc.dtype)

    @pl.when(phase == 1)
    def _weighted_add_pool():
        tg = tg_acc[...]                                          # [B, H] matmul dtype
        # scores[g, n] = <tg[g], x[n]> — same contract-minor (A @ B^T) pattern
        # as flash attention's q @ k^T; lowers to the MXU transposed push, no
        # XLU transpose of the [TN, H] tile.
        scores = jax.lax.dot_general(
            tg, x, (((1,), (1,)), ((), ())),
            preferred_element_type=jnp.float32)                   # [B, TN] f32
        # Gather scores[batch[n], n] via a VPU mask-reduce over the tiny padded
        # graph axis (no K = B matmul), then fold coefs into the one-hot so the
        # weighted [TN, H] intermediate is never materialized.
        coefs = jax.nn.sigmoid(
            jnp.sum(jnp.where(onehot, scores, 0.0),
                    axis=0, keepdims=True))                       # [1, TN] f32
        w_onehot = jnp.where(onehot, coefs, 0.0).astype(x.dtype)  # [B, TN]
        out_ref[...] += jax.lax.dot_general(
            w_onehot, x, (((1,), (0,)), ((), ())),
            preferred_element_type=jnp.float32)                   # [B, H]


def readout_module(x, batch, weight, num_graphs, *,
                   block_n=4096, matmul_dtype=jnp.bfloat16,
                   vmem_budget_bytes=16 * 1024 * 1024):
    """x: [N, H], batch: [N] int, weight: [H, H] -> [num_graphs, H] f32."""
    N, H = x.shape
    H_pad = _round_up(H, 128)
    B_pad = max(8, _round_up(num_graphs, 8))
    N_pad = _round_up(max(N, 1), 128)

    # ---- Node-tile sizing from a VMEM budget (conservative across v5e/v6e/v7x).
    bytes_mm = jnp.dtype(matmul_dtype).itemsize
    fixed_bytes = (2 * H_pad * H_pad * bytes_mm      # weight block (double-buffered)
                   + 2 * B_pad * H_pad * 4           # resident output block
                   + B_pad * H_pad * 4               # sum-pool accumulator scratch
                   + 8 * 128 * 4                     # count scratch (tile padded)
                   + B_pad * H_pad * bytes_mm)       # transformed_global scratch
    per_row_bytes = 2 * (H_pad * bytes_mm + 8 * 4)   # double-buffered x row + batch row
    max_rows = max(128, (vmem_budget_bytes - fixed_bytes) // per_row_bytes)
    max_tile = min(_round_up(block_n, 128), max(128, (max_rows // 128) * 128))

    if N_pad <= max_tile:
        # Whole (padded) node set fits the budget: single x block whose index is
        # constant across both phases -> Pallas fetches x from HBM exactly once.
        tile_n = N_pad
    else:
        # Prefer an exact divisor of N_pad (no extra node padding / copies for
        # already-aligned inputs); fall back to padding the tail if the best
        # divisor would force tiny, overhead-dominated tiles.
        units, max_units = N_pad // 128, max_tile // 128
        div = next((k for k in range(max_units, 0, -1) if units % k == 0), 1)
        tile_n = div * 128 if 2 * div >= max_units else max_tile
    N_final = _round_up(N_pad, tile_n)
    n_tiles = N_final // tile_n

    # ---- Operand prep: skip pad copies when already aligned; fuse pad + cast.
    if N == N_final and H == H_pad:
        x_p = x if x.dtype == matmul_dtype else x.astype(matmul_dtype)
    else:
        x_p = jnp.zeros((N_final, H_pad), matmul_dtype).at[:N, :H].set(
            x.astype(matmul_dtype))
    if H == H_pad:
        w_p = weight if weight.dtype == matmul_dtype else weight.astype(matmul_dtype)
    else:
        w_p = jnp.zeros((H_pad, H_pad), matmul_dtype).at[:H, :H].set(
            weight.astype(matmul_dtype))
    if N == N_final:
        b_p = batch.astype(jnp.int32).reshape(1, N_final)
    else:
        # Padded nodes get batch id == B_pad (outside the graph iota range), so
        # they contribute to nothing.
        b_p = jnp.full((1, N_final), B_pad, jnp.int32).at[0, :N].set(
            batch.astype(jnp.int32))

    out = pl.pallas_call(
        readout_kernel,
        out_shape=jax.ShapeDtypeStruct((B_pad, H_pad), jnp.float32),
        grid_spec=pltpu.PrefetchScalarGridSpec(
            num_scalar_prefetch=0,
            grid=(2, n_tiles),                                    # (phase, node tile)
            in_specs=[
                pl.BlockSpec((1, tile_n), lambda p, n: (0, n)),        # batch row
                pl.BlockSpec((tile_n, H_pad), lambda p, n: (n, 0)),    # x tile
                pl.BlockSpec((H_pad, H_pad), lambda p, n: (0, 0)),     # weight
            ],
            out_specs=pl.BlockSpec((B_pad, H_pad), lambda p, n: (0, 0)),
            scratch_shapes=[
                pltpu.VMEM((B_pad, H_pad), jnp.float32),    # sum-pool accumulator
                pltpu.VMEM((B_pad, 1), jnp.float32),        # per-graph node counts
                pltpu.VMEM((B_pad, H_pad), matmul_dtype),   # transformed_global
            ],
        ),
        compiler_params=pltpu.CompilerParams(
            # Phase 0 must fully precede phase 1 and tiles share accumulators,
            # so both axes stay "arbitrary" (sequential on one TensorCore).
            dimension_semantics=("arbitrary", "arbitrary"),
            vmem_limit_bytes=32 * 1024 * 1024),
    )(b_p, x_p, w_p)
    return out[:num_graphs, :H]


def readout_reference(x, batch, weight, num_graphs):
    """Pure-JAX reference mirroring the PyTorch module."""
    sums = jax.ops.segment_sum(x, batch, num_segments=num_graphs)
    counts = jax.ops.segment_sum(jnp.ones((x.shape[0],), x.dtype), batch,
                                 num_segments=num_graphs)
    mean_pool = sums / jnp.maximum(counts, 1.0)[:, None]
    tg = jnp.tanh(mean_pool @ weight)
    coefs = jax.nn.sigmoid(jnp.sum(x * tg[batch], axis=1))
    weighted = coefs[:, None] * x
    return jax.ops.segment_sum(weighted, batch, num_segments=num_graphs)


if __name__ == "__main__":
    key = jax.random.PRNGKey(0)
    k_x, k_w = jax.random.split(key)

    N = 16          # total number of nodes in the batch
    H = 32          # conf.model.nhid
    num_graphs = 2  # number of graphs

    x = jax.random.normal(k_x, (N, H), dtype=jnp.float32)
    batch = jnp.concatenate([
        jnp.zeros((N // 2,), jnp.int32),
        jnp.ones((N - N // 2,), jnp.int32),
    ])

    # Deterministic Xavier-uniform init for weight [H, H].
    bound = (6.0 / (H + H)) ** 0.5
    weight = jax.random.uniform(k_w, (H, H), jnp.float32, -bound, bound)

    ref = readout_reference(x, batch, weight, num_graphs)

    # Exact path (f32 streaming) — tight tolerance proves numerics.
    out_f32 = jax.block_until_ready(
        readout_module(x, batch, weight, num_graphs, matmul_dtype=jnp.float32))
    assert out_f32.shape == (num_graphs, H)
    assert jnp.allclose(out_f32, ref, atol=1e-5, rtol=1e-4), \
        float(jnp.max(jnp.abs(out_f32 - ref)))

    # Default fast path (bf16 streaming, f32 accumulation) — bf16-appropriate
    # tolerance (x/W/coefs are quantized to bf16 on the way into the MXU).
    out_bf16 = jax.block_until_ready(
        readout_module(x, batch, weight, num_graphs))
    assert out_bf16.shape == (num_graphs, H)
    assert jnp.allclose(out_bf16, ref, atol=5e-2, rtol=5e-2), \
        float(jnp.max(jnp.abs(out_bf16 - ref)))

    print("KERNEL_OK")
</pallas_src>

<mosaic_0001>
module attributes {stable_mosaic.version = 11 : i64} {
  func.func @readout_kernel(%arg0: i32, %arg1: i32, %arg2: memref<1x128xi32, #tpu.memory_space<vmem>>, %arg3: memref<128x128xf32, #tpu.memory_space<vmem>>, %arg4: memref<128x128xf32, #tpu.memory_space<vmem>>, %arg5: memref<8x128xf32, #tpu.memory_space<vmem>>, %arg6: memref<8x128xf32, #tpu.memory_space<vmem>>, %arg7: memref<8x1xf32, #tpu.memory_space<vmem>>, %arg8: memref<8x128xf32, #tpu.memory_space<vmem>>) attributes {dimension_semantics = [#tpu.dimension_semantics<arbitrary>, #tpu.dimension_semantics<arbitrary>], iteration_bounds = array<i64: 2, 1>, scalar_prefetch = 0 : i64, scratch_operands = 3 : i64, tpu.core_type = #tpu.core_type<tc>, window_params = [{transform_indices = @transform_0, window_bounds = array<i64: 1, 128>}, {transform_indices = @transform_1, window_bounds = array<i64: 128, 128>}, {pipeline_mode = #tpu.pipeline_mode<synchronous>, transform_indices = @transform_2, window_bounds = array<i64: 128, 128>}, {pipeline_mode = #tpu.pipeline_mode<synchronous>, transform_indices = @transform_3, window_bounds = array<i64: 8, 128>}]} {
    %c0 = arith.constant 0 : index
    %c0_0 = arith.constant 0 : index
    %0 = vector.load %arg3[%c0, %c0_0] : memref<128x128xf32, #tpu.memory_space<vmem>>, vector<128x128xf32>
    %c0_1 = arith.constant 0 : index
    %c0_2 = arith.constant 0 : index
    %1 = vector.load %arg2[%c0_1, %c0_2] : memref<1x128xi32, #tpu.memory_space<vmem>>, vector<1x128xi32>
    %2 = tpu.iota {dimensions = array<i32: 0>} : vector<8x128xi32>
    %3 = vector.broadcast %1 : vector<1x128xi32> to vector<8x128xi32>
    %4 = arith.cmpi eq, %2, %3 : vector<8x128xi32>
    %c0_i32 = arith.constant 0 : i32
    %5 = arith.cmpi eq, %arg0, %c0_i32 : i32
    %c0_i32_3 = arith.constant 0 : i32
    %6 = arith.cmpi eq, %arg1, %c0_i32_3 : i32
    %7 = arith.andi %5, %6 : i1
    %8 = arith.extui %7 : i1 to i32
    %c0_i32_4 = arith.constant 0 : i32
    %9 = arith.cmpi ne, %8, %c0_i32_4 : i32
    scf.if %9 {
      %cst = arith.constant 0.000000e+00 : f32
      %21 = vector.broadcast %cst : f32 to vector<8x128xf32>
      %c0_11 = arith.constant 0 : index
      %c0_12 = arith.constant 0 : index
      %22 = vector.load %arg6[%c0_11, %c0_12] : memref<8x128xf32, #tpu.memory_space<vmem>>, vector<8x128xf32>
      tpu.vector_store %arg6[%c0_11, %c0_12], %21 {strides = array<i32>} : memref<8x128xf32, #tpu.memory_space<vmem>>, vector<8x128xf32>,
      %cst_13 = arith.constant 0.000000e+00 : f32
      %23 = vector.broadcast %cst_13 : f32 to vector<8x1xf32>
      %c0_14 = arith.constant 0 : index
      %c0_15 = arith.constant 0 : index
      %24 = vector.load %arg7[%c0_14, %c0_15] : memref<8x1xf32, #tpu.memory_space<vmem>>, vector<8x1xf32>
      tpu.vector_store %arg7[%c0_14, %c0_15], %23 {strides = array<i32>} : memref<8x1xf32, #tpu.memory_space<vmem>>, vector<8x1xf32>,
      %cst_16 = arith.constant 0.000000e+00 : f32
      %25 = vector.broadcast %cst_16 : f32 to vector<8x128xf32>
      %c0_17 = arith.constant 0 : index
      %c0_18 = arith.constant 0 : index
      %26 = vector.load %arg5[%c0_17, %c0_18] : memref<8x128xf32, #tpu.memory_space<vmem>>, vector<8x128xf32>
      tpu.vector_store %arg5[%c0_17, %c0_18], %25 {strides = array<i32>} : memref<8x128xf32, #tpu.memory_space<vmem>>, vector<8x128xf32>,
    } else {
    }
    %c0_i32_5 = arith.constant 0 : i32
    %10 = arith.cmpi eq, %arg0, %c0_i32_5 : i32
    %11 = arith.extui %10 : i1 to i32
    %c0_i32_6 = arith.constant 0 : i32
    %12 = arith.cmpi ne, %11, %c0_i32_6 : i32
    scf.if %12 {
      %c0_11 = arith.constant 0 : index
      %c0_12 = arith.constant 0 : index
      %21 = vector.load %arg6[%c0_11, %c0_12] : memref<8x128xf32, #tpu.memory_space<vmem>>, vector<8x128xf32>
      %22 = arith.extui %4 : vector<8x128xi1> to vector<8x128xi32>
      %23 = arith.sitofp %22 : vector<8x128xi32> to vector<8x128xf32>
      %cst = arith.constant dense<0.000000e+00> : vector<8x128xf32>
      %24 = tpu.matmul %23, %0, %cst {dimension_numbers = #tpu.dot_dimension_numbers<[1], [0], [0], [1], [0, 0, 1, 1], [], []>} : vector<8x128xf32>, vector<128x128xf32>, vector<8x128xf32> -> vector<8x128xf32>
      %25 = arith.addf %21, %24 : vector<8x128xf32>
      %c0_13 = arith.constant 0 : index
      %c0_14 = arith.constant 0 : index
      %26 = vector.load %arg6[%c0_13, %c0_14] : memref<8x128xf32, #tpu.memory_space<vmem>>, vector<8x128xf32>
      tpu.vector_store %arg6[%c0_13, %c0_14], %25 {strides = array<i32>} : memref<8x128xf32, #tpu.memory_space<vmem>>, vector<8x128xf32>,
      %c0_15 = arith.constant 0 : index
      %c0_16 = arith.constant 0 : index
      %27 = vector.load %arg7[%c0_15, %c0_16] : memref<8x1xf32, #tpu.memory_space<vmem>>, vector<8x1xf32>
      %28 = arith.extui %4 : vector<8x128xi1> to vector<8x128xi32>
      %29 = arith.sitofp %28 : vector<8x128xi32> to vector<8x128xf32>
      %cst_17 = arith.constant dense<0.000000e+00> : vector<8xf32>
      %30 = vector.multi_reduction <add>, %29, %cst_17 [1] : vector<8x128xf32> to vector<8xf32>
      %31 = vector.shape_cast %30 : vector<8xf32> to vector<8x1xf32>
      %32 = arith.addf %27, %31 : vector<8x1xf32>
      %c0_18 = arith.constant 0 : index
      %c0_19 = arith.constant 0 : index
      %33 = vector.load %arg7[%c0_18, %c0_19] : memref<8x1xf32, #tpu.memory_space<vmem>>, vector<8x1xf32>
      tpu.vector_store %arg7[%c0_18, %c0_19], %32 {strides = array<i32>} : memref<8x1xf32, #tpu.memory_space<vmem>>, vector<8x1xf32>,
    } else {
    }
    %c1_i32 = arith.constant 1 : i32
    %13 = arith.cmpi eq, %arg0, %c1_i32 : i32
    %c0_i32_7 = arith.constant 0 : i32
    %14 = arith.cmpi eq, %arg1, %c0_i32_7 : i32
    %15 = arith.andi %13, %14 : i1
    %16 = arith.extui %15 : i1 to i32
    %c0_i32_8 = arith.constant 0 : i32
    %17 = arith.cmpi ne, %16, %c0_i32_8 : i32
    scf.if %17 {
      %c0_11 = arith.constant 0 : index
      %c0_12 = arith.constant 0 : index
      %21 = vector.load %arg7[%c0_11, %c0_12] : memref<8x1xf32, #tpu.memory_space<vmem>>, vector<8x1xf32>
      %cst = arith.constant 1.000000e+00 : f32
      %22 = vector.broadcast %cst : f32 to vector<8x1xf32>
      %23 = arith.maximumf %21, %22 : vector<8x1xf32>
      %24 = tpu.reciprocal %23 : vector<8x1xf32> -> vector<8x1xf32>
      %c0_13 = arith.constant 0 : index
      %c0_14 = arith.constant 0 : index
      %25 = vector.load %arg6[%c0_13, %c0_14] : memref<8x128xf32, #tpu.memory_space<vmem>>, vector<8x128xf32>
      %26 = vector.broadcast %24 : vector<8x1xf32> to vector<8x128xf32>
      %27 = arith.mulf %25, %26 : vector<8x128xf32>
      %c0_15 = arith.constant 0 : index
      %c0_16 = arith.constant 0 : index
      %28 = vector.load %arg4[%c0_15, %c0_16] : memref<128x128xf32, #tpu.memory_space<vmem>>, vector<128x128xf32>
      %cst_17 = arith.constant dense<0.000000e+00> : vector<8x128xf32>
      %29 = tpu.matmul %27, %28, %cst_17 {dimension_numbers = #tpu.dot_dimension_numbers<[1], [0], [0], [1], [0, 0, 1, 1], [], []>} : vector<8x128xf32>, vector<128x128xf32>, vector<8x128xf32> -> vector<8x128xf32>
      %30 = math.tanh %29 : vector<8x128xf32>
      %c0_18 = arith.constant 0 : index
      %c0_19 = arith.constant 0 : index
      %31 = vector.load %arg8[%c0_18, %c0_19] : memref<8x128xf32, #tpu.memory_space<vmem>>, vector<8x128xf32>
      tpu.vector_store %arg8[%c0_18, %c0_19], %30 {strides = array<i32>} : memref<8x128xf32, #tpu.memory_space<vmem>>, vector<8x128xf32>,
    } else {
    }
    %c1_i32_9 = arith.constant 1 : i32
    %18 = arith.cmpi eq, %arg0, %c1_i32_9 : i32
    %19 = arith.extui %18 : i1 to i32
    %c0_i32_10 = arith.constant 0 : i32
    %20 = arith.cmpi ne, %19, %c0_i32_10 : i32
    scf.if %20 {
      %c0_11 = arith.constant 0 : index
      %c0_12 = arith.constant 0 : index
      %21 = vector.load %arg8[%c0_11, %c0_12] : memref<8x128xf32, #tpu.memory_space<vmem>>, vector<8x128xf32>
      %cst = arith.constant dense<0.000000e+00> : vector<8x128xf32>
      %22 = tpu.matmul %21, %0, %cst {dimension_numbers = #tpu.dot_dimension_numbers<[1], [1], [0], [0], [0, 0, 1, 0], [], []>} : vector<8x128xf32>, vector<128x128xf32>, vector<8x128xf32> -> vector<8x128xf32>
      %cst_13 = arith.constant 0.000000e+00 : f32
      %23 = vector.broadcast %cst_13 : f32 to vector<8x128xf32>
      %24 = arith.select %4, %22, %23 : vector<8x128xi1>, vector<8x128xf32>
      %cst_14 = arith.constant dense<0.000000e+00> : vector<128xf32>
      %25 = vector.multi_reduction <add>, %24, %cst_14 [0] : vector<8x128xf32> to vector<128xf32>
      %26 = vector.shape_cast %25 : vector<128xf32> to vector<1x128xf32>
      %27 = arith.negf %26 : vector<1x128xf32>
      %28 = math.exp %27 : vector<1x128xf32>
      %cst_15 = arith.constant 1.000000e+00 : f32
      %29 = vector.broadcast %cst_15 : f32 to vector<1x128xf32>
      %30 = arith.addf %29, %28 : vector<1x128xf32>
      %31 = arith.divf %29, %30 : vector<1x128xf32>
      %cst_16 = arith.constant 0.000000e+00 : f32
      %32 = vector.shape_cast %31 : vector<1x128xf32> to vector<1x128xf32>
      %33 = vector.broadcast %32 : vector<1x128xf32> to vector<8x128xf32>
      %34 = vector.broadcast %cst_16 : f32 to vector<8x128xf32>
      %35 = arith.select %4, %33, %34 : vector<8x128xi1>, vector<8x128xf32>
      %c0_17 = arith.constant 0 : index
      %c0_18 = arith.constant 0 : index
      %36 = vector.load %arg5[%c0_17, %c0_18] : memref<8x128xf32, #tpu.memory_space<vmem>>, vector<8x128xf32>
      %cst_19 = arith.constant dense<0.000000e+00> : vector<8x128xf32>
      %37 = tpu.matmul %35, %0, %cst_19 {dimension_numbers = #tpu.dot_dimension_numbers<[1], [0], [0], [1], [0, 0, 1, 1], [], []>} : vector<8x128xf32>, vector<128x128xf32>, vector<8x128xf32> -> vector<8x128xf32>
      %38 = arith.addf %36, %37 : vector<8x128xf32>
      %c0_20 = arith.constant 0 : index
      %c0_21 = arith.constant 0 : index
      %39 = vector.load %arg5[%c0_20, %c0_21] : memref<8x128xf32, #tpu.memory_space<vmem>>, vector<8x128xf32>
      tpu.vector_store %arg5[%c0_20, %c0_21], %38 {strides = array<i32>} : memref<8x128xf32, #tpu.memory_space<vmem>>, vector<8x128xf32>,
    } else {
    }
    return
  }
  func.func @transform_0(%arg0: i32, %arg1: i32) -> (i32, i32) {
    %c0_i32 = arith.constant 0 : i32
    %c0_i32_0 = arith.constant 0 : i32
    return %c0_i32, %arg1 : i32, i32
  }
  func.func @transform_1(%arg0: i32, %arg1: i32) -> (i32, i32) {
    %c0_i32 = arith.constant 0 : i32
    %c0_i32_0 = arith.constant 0 : i32
    return %arg1, %c0_i32 : i32, i32
  }
  func.func @transform_2(%arg0: i32, %arg1: i32) -> (i32, i32) {
    %c0_i32 = arith.constant 0 : i32
    %c0_i32_0 = arith.constant 0 : i32
    %c0_i32_1 = arith.constant 0 : i32
    return %c0_i32, %c0_i32_0 : i32, i32
  }
  func.func @transform_3(%arg0: i32, %arg1: i32) -> (i32, i32) {
    %c0_i32 = arith.constant 0 : i32
    %c0_i32_0 = arith.constant 0 : i32
    %c0_i32_1 = arith.constant 0 : i32
    return %c0_i32, %c0_i32_0 : i32, i32
  }
}

</mosaic_0001>

<bundles_post_ra>
// kernel: tpu_custom_call.1
= control target key start
LH: loop header
LB: loop body
LE: loop exit
PB: predicated region body
PF: predicated region fallthrough
CT: control target
= control target key end

     0   :  { %8 = vsyncpa [#allocation6], 0  ;;  %s963_s0 = inlined_call_operand.hbm [shape: s32[1,128], index: 0, kind: input, shape index: {}]   ;;  %s964_s1 = inlined_call_operand.hbm [shape: f32[128,128], index: 1, kind: input, shape index: {}]   ;;  %s965_s2 = inlined_call_operand.hbm [shape: f32[128,128], index: 2, kind: input, shape index: {}]   ;;  %s966_s3 = inlined_call_operand.hbm [shape: f32[8,128], index: 3, kind: output, shape index: {}]  }
   0x1   :  { %9 = vsyncpa [#allocation9], 0 }
   0x2   :  { %10 = vsyncpa [#allocation7], 0  ;;  %s781_s12 = smov 0   ;;  %s783_s13 = smov 0  }
   0x3   :  { %s785_s14 = smov 0  }
   0x4 LB: > { %s154_s17 = sshll.u32 %s964_s1, 4  ;;  %s496_s18 = sadd.s32 4294967295, %s749_s14   ;;  %s749_s14 = sphi %s785_s14, %s16_s14   ;;  %s745_s13 = sphi %s783_s13, %s971_s13   ;;  %s741_s12 = sphi %s781_s12, %s970_s12   ;;  %s155_s17 = int_to_ptr.hbm [resolvable:$true] %s154_s17 }
   0x5   : > { %p497_p0 = scmp.ge.s32.totalorder %s749_s14, 1  ;;  %p127_p1 = scmp.lt.s32.totalorder %s749_s14, 3 }
   0x6   : > { %p804_p2 = scmp.eq.s32.totalorder %s496_s18, 0  ;;  %s751_s21 = smov [#allocation8]  }
   0x7   : > { %p808_p3 = pnand %p497_p0, %p127_p1  ;;  %s156_s22 = sshll.u32 %s751_s21, 4  ;;  %s157_s22 = int_to_ptr.vmem [resolvable:$true] %s156_s22 }
   0x8   : > { %s28_s24 = sadd.s32 1, %s745_s13  ;;  %s752_s25 = smov 128  }
   0x9   : > { %p535_p4 = pneg %p808_p3  ;;  %p30_p6 = scmp.ge.s32.totalorder %s28_s24, 2 }
   0xa   : > { %s753_s26 = smov 8   ;;  %s140_s29 = sshll.u32 %s963_s0, 4  ;;  %s141_s29 = int_to_ptr.hbm [resolvable:$true] %s140_s29 }
   0xb   : > { %p816_p5 = pnand %p804_p2, %p535_p4  ;;  %s973_s24 = smov (%p30_p6, %s28_s24), 0 }
   0xc   : > { %s754_s30 = smov [#allocation5]   ;;  %s168_s7 = sshll.u32 %s965_s2, 4  ;;  %s169_s7 = int_to_ptr.hbm [resolvable:$true] %s168_s7 }
   0xd   : > { %541 = dma.hbm_to_vmem [thread:$0]  (!%p816_p5), %s155_s17, 2048, %s157_s22, [#allocation9], %s752_s25, %s752_s25, %s753_s26  }
   0xe   : > { %s142_s4 = sshll.u32 %s754_s30, 4  ;;  %s755_s8 = smov [#allocation10]   ;;  %s143_s4 = int_to_ptr.vmem [resolvable:$true] %s142_s4 }
   0xf   : > { %538 = dma.hbm_to_vmem [thread:$0]  (!%p816_p5), %s141_s29, 16, %s143_s4, [#allocation6]  }
  0x10   : > { %s170_s9 = sshll.u32 %s755_s8, 4  ;;  %186 = sbr.rel (%p808_p3) target bundleno = 843 (0x34b), region = 32  ;;  %s171_s9 = int_to_ptr.vmem [resolvable:$true] %s170_s9 }
  0x11   : > { %544 = dma.hbm_to_vmem [thread:$0]  (!%p816_p5), %s169_s7, 2048, %s171_s9, [#allocation9], %s752_s25, %s752_s25, %s753_s26  }
  0x15   : > { %728 = dma.done.wait (%p804_p2), [#allocation6], 16  }
  0x16   : > { %730 = vsyncadd (%p804_p2), [#allocation6], 4294967280 }
  0x17   : > { %732 = dma.done.wait (%p804_p2), [#allocation9], 4096  }
  0x18   : > { %734 = vsyncadd (%p804_p2), [#allocation9], 4294963200  ;;  %p233_p7 = scmp.eq.s32.totalorder %s741_s12, 0  ;;  %v229_v0 = vlaneseq  ;;  %v846_v1 = vld [vmem:[#allocation8] sm:$0xff]  ;;  %v848_v2 = vld [vmem:[#allocation8 + $0x8] sm:$0xff] }
  0x19   : > { %v850_v3 = vld [vmem:[#allocation8 + $0x10] sm:$0xff]  ;;  %v852_v4 = vld [vmem:[#allocation8 + $0x18] sm:$0xff]  ;;  %v854_v5 = vld [vmem:[#allocation8 + $0x20] sm:$0xff]  ;;  %vm240_vm1 = vcmask (%p233_p7), 7168   ;;  %v756_v19 = vmov (%p233_p7), 0.0  }
  0x1a   : > { %v856_v6 = vld [vmem:[#allocation8 + $0x28] sm:$0xff]  ;;  %v858_v7 = vld [vmem:[#allocation8 + $0x30] sm:$0xff]  ;;  %v860_v8 = vld [vmem:[#allocation8 + $0x38] sm:$0xff]  ;;  %v870_v13 = vshrl.u32 %v229_v0, 7  ;;  %239 = vst [vmem:[#allocation2] sm:$0xff] (%p233_p7), %v756_v19 }
  0x1b   : > { %v862_v9 = vld [vmem:[#allocation8 + $0x40] sm:$0xff]  ;;  %v864_v10 = vld [vmem:[#allocation8 + $0x48] sm:$0xff]  ;;  %v866_v11 = vld [vmem:[#allocation8 + $0x50] sm:$0xff]  ;;  %238 = sbr.rel (!%p233_p7) target bundleno = 32 (0x20), region = 48  ;;  %242 = vst [vmem:[#allocation11] sm:$0xff] (%p233_p7), %v756_v19 }
  0x1c   : > { %v868_v12 = vld [vmem:[#allocation8 + $0x58] sm:$0xff]  ;;  %v872_v14 = vld [vmem:[#allocation8 + $0x60] sm:$0xff]  ;;  %v874_v15 = vld [vmem:[#allocation8 + $0x68] sm:$0xff]  ;;  %241 = vst.msk [vmem:[#allocation3] sm:$0xff] (%p233_p7), %vm240_vm1, %v756_v19 }
  0x1d   : > { %v876_v16 = vld [vmem:[#allocation8 + $0x70] sm:$0xff]  ;;  %v878_v17 = vld [vmem:[#allocation8 + $0x78] sm:$0xff] }
  0x1e   : > { %v880_v18 = vld [vmem:[#allocation5] ss:$0 sm:$0xff] }
  0x1f   : > { %vm232_vm0 = vcmp.eq.s32.totalorder %v870_v13, %v880_v18 }
  0x20 PF: > { %p506_p8 = scmp.ne.s32.totalorder %s741_s12, 0 }
  0x22   : > { %245 = sbr.rel (%p506_p8) target bundleno = 199 (0xc7), region = 52 }
  0x27   : > { %249 = vmatpush.msra.mxu0 %v878_v17  ;;  %v757_v20 = vmov 0.0   ;;  %v758_v22 = vmov 1.0   ;;  %v271_v23 = vld [vmem:[#allocation3] sm:$0xff]  ;;  %vm275_vm2 = vcmask 7168   ;;  %v246_v26 = vld [vmem:[#allocation2] sm:$0xff] }
  0x28   : > { %v507_v21 = vsel %vm232_vm0, 1.0, %v757_v20 }
  0x29   : > { %250 = vmatpush.msra.mxu0 %v876_v16  ;;  %272 = vadd.xlane.f32.xlu0 %v507_v21 }
  0x2b   : > { %251 = vmatpush.msra.mxu0 %v874_v15 }
  0x2d   : > { %252 = vmatpush.msra.mxu0 %v872_v14 }
  0x2f   : > { %253 = vmatpush.msra.mxu0 %v868_v12 }
  0x31   : > { %254 = vmatpush.msra.mxu0 %v866_v11 }
  0x33   : > { %255 = vmatpush.msra.mxu0 %v864_v10 }
  0x35   : > { %256 = vmatpush.msra.mxu0 %v862_v9 }
  0x37   : > { %257 = vmatpush.msra.mxu0 %v860_v8 }
  0x39   : > { %258 = vmatpush.msra.mxu0 %v858_v7 }
  0x3b   : > { %259 = vmatpush.msra.mxu0 %v856_v6 }
  0x3d   : > { %260 = vmatpush.msra.mxu0 %v854_v5 }
  0x3f   : > { %261 = vmatpush.msra.mxu0 %v852_v4 }
  0x41   : > { %262 = vmatpush.msra.mxu0 %v850_v3 }
  0x43   : > { %263 = vmatpush.msra.mxu0 %v848_v2 }
  0x45   : > { %264 = vmatpush.msra.mxu0 %v846_v1 }
  0x46   : > { %508 = vmatmul.msk.f32.vlgmr.msra.gmra.mxu0 %vm232_vm0, %v758_v22 }
  0x9c   : > { %v273_v24 = vpop.xlane.xlu0 %272 }
  0x9d   : > { %v274_v25 = vadd.f32 %v273_v24, %v271_v23 }
  0x9f   : > { %276 = vst.msk [vmem:[#allocation3] sm:$0xff] %vm275_vm2, %v274_v25 }
  0xc3   : > { %v266_v27 = vpop.f32.mrf.mxu0 }
  0xc4   : > { %v269_v28 = vadd.f32 %v266_v27, %v246_v26 }
  0xc6   : > { %270 = vst [vmem:[#allocation2] sm:$0xff] %v269_v28 }
  0xc7 PF: > { %p277_p9 = scmp.eq.s32.totalorder %s741_s12, 1 }
  0xc8   : > { %v282_v29 = vld [vmem:[#allocation3] sm:$0xff] (%p277_p9)  ;;  %v320_v30 = vld [vmem:[#allocation10 + $0x78] sm:$0xff] (%p277_p9)  ;;  %v759_v32 = vmov (%p277_p9), 0   ;;  %v317_v35 = vld [vmem:[#allocation10 + $0x60] sm:$0xff] (%p277_p9) }
  0xc9   : > { %281 = sbr.rel (!%p277_p9) target bundleno = 471 (0x1d7), region = 56  ;;  %v319_v31 = vld [vmem:[#allocation10 + $0x70] sm:$0xff] (%p277_p9)  ;;  %588 = vset.pattern.permute.xlu0 (%p277_p9), %v759_v32  ;;  %v283_v33 = vmax.f32 (%p277_p9), %v282_v29, 1.0  ;;  %321 = vmatpush.msra.mxu0 (%p277_p9), %v320_v30  ;;  %v318_v34 = vld [vmem:[#allocation10 + $0x68] sm:$0xff] (%p277_p9)  ;;  %v316_v36 = vld [vmem:[#allocation10 + $0x58] sm:$0xff] (%p277_p9) }
  0xca   : > { %v315_v37 = vld [vmem:[#allocation10 + $0x50] sm:$0xff] (%p277_p9)  ;;  %v314_v40 = vld [vmem:[#allocation10 + $0x48] sm:$0xff] (%p277_p9)  ;;  %v313_v44 = vld [vmem:[#allocation10 + $0x40] sm:$0xff] (%p277_p9) }
  0xcb   : > { %589 = vrcp.f32 (%p277_p9), %v283_v33  ;;  %322 = vmatpush.msra.mxu0 (%p277_p9), %v319_v31  ;;  %v295_v41 = vand.u32 (%p277_p9), 2147483648, %v283_v33  ;;  %vm289_vm3 = vweird.f32 (%p277_p9), %v283_v33  ;;  %v293_v43 = vand.u32 (%p277_p9), 2147483647, %v283_v33  ;;  %v312_v46 = vld [vmem:[#allocation10 + $0x38] sm:$0xff] (%p277_p9)  ;;  %v311_v49 = vld [vmem:[#allocation10 + $0x30] sm:$0xff] (%p277_p9)  ;;  %v310_v51 = vld [vmem:[#allocation10 + $0x28] sm:$0xff] (%p277_p9) }
  0xcc   : > { %v309_v53 = vld [vmem:[#allocation10 + $0x20] sm:$0xff] (%p277_p9)  ;;  %v308_v54 = vld [vmem:[#allocation10 + $0x18] sm:$0xff] (%p277_p9)  ;;  %v307_v55 = vld [vmem:[#allocation10 + $0x10] sm:$0xff] (%p277_p9) }
  0xcd   : > { %323 = vmatpush.msra.mxu0 (%p277_p9), %v318_v34  ;;  %v296_v47 = vor.u32 (%p277_p9), 1.1754944e-38, %v295_v41  ;;  %vm294_vm6 = vcmp.eq.f32.partialorder (%p277_p9), %v293_v43, 8.507059e+37  ;;  %v306_v56 = vld [vmem:[#allocation10 + $0x8] sm:$0xff] (%p277_p9)  ;;  %v305_v57 = vld [vmem:[#allocation10] sm:$0xff] (%p277_p9) }
  0xce   : > { %v298_v58 = vld [vmem:[#allocation2] sm:$0xff] }
  0xcf   : > { %324 = vmatpush.msra.mxu0 %v317_v35 }
  0xd1   : > { %v590_v38 = vpop.eup %589  ;;  %325 = vmatpush.msra.mxu0 %v316_v36 }
  0xd2   : > { %v285_v39 = vmul.f32 %v590_v38, %v283_v33  ;;  %vm290_vm4 = vweird.f32 %v590_v38 }
  0xd3   : > { %326 = vmatpush.msra.mxu0 %v315_v37  ;;  %vm291_vm5 = vmor %vm289_vm3, %vm290_vm4 }
  0xd4   : > { %v286_v42 = vsub.f32 1.0, %v285_v39 }
  0xd5   : > { %327 = vmatpush.msra.mxu0 %v314_v40 }
  0xd6   : > { %v287_v45 = vmul.f32 %v590_v38, %v286_v42 }
  0xd7   : > { %328 = vmatpush.msra.mxu0 %v313_v44 }
  0xd8   : > { %v288_v48 = vadd.f32 %v590_v38, %v287_v45 }
  0xd9   : > { %329 = vmatpush.msra.mxu0 %v312_v46 }
  0xda   : > { %v292_v50 = vsel %vm291_vm5, %v590_v38, %v288_v48 }
  0xdb   : > { %v297_v52 = vsel %vm294_vm6, %v296_v47, %v292_v50  ;;  %330 = vmatpush.msra.mxu0 %v311_v49 }
  0xdc   : > { %301 = vperm.xlu0 %588, %v297_v52  }
  0xdd   : > { %331 = vmatpush.msra.mxu0 %v310_v51 }
  0xdf   : > { %332 = vmatpush.msra.mxu0 %v309_v53 }
  0xe1   : > { %333 = vmatpush.msra.mxu0 %v308_v54 }
  0xe3   : > { %334 = vmatpush.msra.mxu0 %v307_v55 }
  0xe5   : > { %335 = vmatpush.msra.mxu0 %v306_v56 }
  0xe7   : > { %336 = vmatpush.msra.mxu0 %v305_v57 }
 0x14e   : > { %v302_v59 = vpop.permute.xlu0 %301 }
 0x14f   : > { %v304_v60 = vmul.f32 %v302_v59, %v298_v58 }
 0x151   : > { %337 = vmatmul.f32.vlgmr.msra.gmra.mxu0 %v304_v60 }
 0x1ce   : > { %v338_v61 = vpop.f32.mrf.mxu0 }
 0x1cf   : > { %591 = vtanh.f32 %v338_v61 }
 0x1d5   : > { %v592_v62 = vpop.eup %591 }
 0x1d6   : > { %342 = vst [vmem:[#allocation4] sm:$0xff] %v592_v62 }
 0x1d7 PF: > { %p510_p10 = scmp.ne.s32.totalorder %s741_s12, 1 }
 0x1d9   : > { %345 = sbr.rel (%p510_p10) target bundleno = 837 (0x345), region = 60 }
 0x1de   : > { %347 = vmatpush.xpose.msra.mxu0 %v878_v17  ;;  %395 = vmatpush.msra.mxu1 %v878_v17  ;;  %v346_v63 = vld [vmem:[#allocation4] sm:$0xff]  ;;  %v394_v23 = vld [vmem:[#allocation11] sm:$0xff] }
 0x1e0   : > { %396 = vmatpush.msra.mxu1 %v876_v16 }
 0x1e2   : > { %348 = vmatpush.xpose.msra.mxu0 %v876_v16  ;;  %397 = vmatpush.msra.mxu1 %v874_v15 }
 0x1e4   : > { %398 = vmatpush.msra.mxu1 %v872_v14 }
 0x1e6   : > { %349 = vmatpush.xpose.msra.mxu0 %v874_v15  ;;  %399 = vmatpush.msra.mxu1 %v868_v12 }
 0x1e8   : > { %400 = vmatpush.msra.mxu1 %v866_v11 }
 0x1ea   : > { %350 = vmatpush.xpose.msra.mxu0 %v872_v14  ;;  %401 = vmatpush.msra.mxu1 %v864_v10 }
 0x1ec   : > { %402 = vmatpush.msra.mxu1 %v862_v9 }
 0x1ee   : > { %351 = vmatpush.xpose.msra.mxu0 %v868_v12  ;;  %403 = vmatpush.msra.mxu1 %v860_v8 }
 0x1f0   : > { %404 = vmatpush.msra.mxu1 %v858_v7 }
 0x1f2   : > { %352 = vmatpush.xpose.msra.mxu0 %v866_v11  ;;  %405 = vmatpush.msra.mxu1 %v856_v6 }
 0x1f4   : > { %406 = vmatpush.msra.mxu1 %v854_v5 }
 0x1f6   : > { %353 = vmatpush.xpose.msra.mxu0 %v864_v10  ;;  %407 = vmatpush.msra.mxu1 %v852_v4 }
 0x1f8   : > { %408 = vmatpush.msra.mxu1 %v850_v3 }
 0x1fa   : > { %354 = vmatpush.xpose.msra.mxu0 %v862_v9  ;;  %409 = vmatpush.msra.mxu1 %v848_v2 }
 0x1fc   : > { %410 = vmatpush.msra.mxu1 %v846_v1 }
 0x1fe   : > { %355 = vmatpush.xpose.msra.mxu0 %v860_v8 }
 0x202   : > { %356 = vmatpush.xpose.msra.mxu0 %v858_v7 }
 0x206   : > { %357 = vmatpush.xpose.msra.mxu0 %v856_v6 }
 0x20a   : > { %358 = vmatpush.xpose.msra.mxu0 %v854_v5 }
 0x20e   : > { %359 = vmatpush.xpose.msra.mxu0 %v852_v4 }
 0x212   : > { %360 = vmatpush.xpose.msra.mxu0 %v850_v3 }
 0x216   : > { %361 = vmatpush.xpose.msra.mxu0 %v848_v2 }
 0x21a   : > { %362 = vmatpush.xpose.msra.mxu0 %v846_v1 }
 0x21d   : > { %363 = vmatmul.f32.vlgmr.msra.gmra.mxu0 %v346_v63 }
 0x29a   : > { %v364_v0 = vpop.f32.mrf.mxu0 }
 0x29b   : > { %v367_v8 = vsel %vm232_vm0, %v364_v0, 0.0 }
 0x29c   : > { %v368_v7 = vrot.slane %v367_v8, 4 }
 0x29e   : > { %v369_v9 = vadd.f32 %v368_v7, %v367_v8 }
 0x2a0   : > { %v370_v6 = vrot.slane %v369_v9, 2 }
 0x2a2   : > { %v371_v10 = vadd.f32 %v370_v6, %v369_v9 }
 0x2a4   : > { %v372_v5 = vrot.slane %v371_v10, 1 }
 0x2a6   : > { %v373_v11 = vadd.f32 %v372_v5, %v371_v10 }
 0x2a8   : > { %v511_v4 = vmul.f32 -1.442695, %v373_v11 }
 0x2aa   : > { %593 = vpow2.f32 %v511_v4 }
 0x2b0   : > { %v594_v3 = vpop.eup %593 }
 0x2b1   : > { %v377_v12 = vadd.f32 1.0, %v594_v3 }
 0x2b3   : > { %595 = vrcp.f32 %v377_v12  ;;  %v389_v15 = vand.u32 2147483648, %v377_v12  ;;  %v387_v17 = vand.u32 2147483647, %v377_v12  ;;  %vm383_vm8 = vweird.f32 %v377_v12 }
 0x2b5   : > { %v390_v20 = vor.u32 1.1754944e-38, %v389_v15  ;;  %vm388_vm10 = vcmp.eq.f32.partialorder %v387_v17, 8.507059e+37 }
 0x2b9   : > { %v596_v2 = vpop.eup %595 }
 0x2ba   : > { %v379_v1 = vmul.f32 %v596_v2, %v377_v12  ;;  %vm384_vm7 = vweird.f32 %v596_v2 }
 0x2bb   : > { %vm385_vm9 = vmor %vm383_vm8, %vm384_vm7 }
 0x2bc   : > { %v380_v14 = vsub.f32 1.0, %v379_v1 }
 0x2be   : > { %v381_v16 = vmul.f32 %v596_v2, %v380_v14 }
 0x2c0   : > { %v382_v19 = vadd.f32 %v596_v2, %v381_v16 }
 0x2c2   : > { %v386_v21 = vsel %vm385_vm9, %v596_v2, %v382_v19 }
 0x2c3   : > { %v391_v22 = vsel %vm388_vm10, %v390_v20, %v386_v21 }
 0x2c4   : > { %512 = vmatmul.msk.f32.vlgmr.msra.gmra.mxu1 %vm232_vm0, %v391_v22 }
 0x341   : > { %v412_v24 = vpop.f32.mrf.mxu1 }
 0x342   : > { %v415_v25 = vadd.f32 %v412_v24, %v394_v23 }
 0x344   : > { %416 = vst [vmem:[#allocation11] sm:$0xff] %v415_v25 }
 0x345 PF: > { %p551_p11 = scmp.eq.s32.totalorder %s496_s18, 1  ;;  %s425_s12 = sshll.u32 %s966_s3, 4  ;;  %s426_s12 = int_to_ptr.hbm [resolvable:$true] %s425_s12 }
 0x346   : > { %s760_s15 = smov [#allocation11]  }
 0x347   : > { %s423_s16 = sshll.u32 %s760_s15, 4  ;;  %s424_s16 = int_to_ptr.vmem [resolvable:$true] %s423_s16 }
 0x348   : > { %532 = dma.vmem_to_hbm [thread:$0]  (%p551_p11), %s424_s16, 128, %s426_s12, [#allocation7]  }
 0x349   : > { %736 = dma.done.wait (%p551_p11), [#allocation7], 128  }
 0x34a   : > { %738 = vsyncadd (%p551_p11), [#allocation7], 4294967168 }
 0x34b PF: > { %s16_s14 = sadd.s32 1, %s749_s14   ;;  %s970_s12 = smov %s745_s13 }
 0x34c   : > { %p13_p12 = scmp.ge.s32.totalorder %s16_s14, 4   ;;  %s971_s13 = smov %s973_s24 }
 0x34e   :  { %15 = sbr.rel (!%p13_p12) target bundleno = 4 (0x4), region = 87 }
 0x353   :  { %439 = vsyncpa [#allocation6], 1 }
 0x354   :  { %441 = vsyncpa [#allocation6 + $0x1], 1 }
 0x355   :  { %442 = vsyncpa [#allocation9], 1 }
 0x356   :  { %443 = vsyncpa [#allocation7], 1 }
 0x357   :  { %445 = vsyncpa [#allocation7 + $0x1], 1 }

</bundles_post_ra>
